<compile_context>
chip_gen: v5e
topology: v5e:2x2
jax: 0.10.0
libtpu: 0.0.40
codegen_flags: <defaults>
</compile_context>

<pallas_src>
import functools

import jax
import jax.numpy as jnp
from jax import lax
from jax.experimental import pallas as pl
from jax.experimental.pallas import tpu as pltpu


def _mlp_kernel(x_ref, w1_ref, b1_ref, w2_ref, b2_ref, w3_ref, b3_ref, o_ref,
                *, chunk, n_chunks):
    # x_ref / o_ref: (1, TILE), batch on lanes.
    h1_dim = w1_ref.shape[0]

    # Hoisted lane-broadcasts of the layer-1 params (done once per grid step,
    # NOT per chunk -- JAX does not CSE broadcast_in_dim).
    w1b = jnp.broadcast_to(w1_ref[...], (h1_dim, chunk))   # (64, chunk), l1 dtype
    b1b = jnp.broadcast_to(b1_ref[...], (h1_dim, chunk))   # (64, chunk), l1 dtype
    w2 = w2_ref[...]                                        # (32, 64) bf16
    b2 = b2_ref[...]                                        # (32, 1)  f32
    w3 = w3_ref[...]                                        # (32, 1)  f32
    b3 = b3_ref[...]                                        # (1, 1)   f32

    def body(c, carry):
        off = pl.multiple_of(c * chunk, chunk)
        xc = x_ref[:, pl.ds(off, chunk)].astype(w1b.dtype)          # (1, chunk)

        # Layer 1: in_dim = 1  ->  pure VPU broadcast MAC.
        h1 = jnp.maximum(w1b * xc + b1b, 0.0)                       # (64, chunk)

        # Layer 2: the only real matmul (32,64)@(64,chunk), bf16 MXU / f32 acc.
        h2 = jnp.dot(w2, h1.astype(jnp.bfloat16),
                     preferred_element_type=jnp.float32) + b2
        h2 = jnp.maximum(h2, 0.0)                                    # (32, chunk)

        # Layer 3: out_dim = 1 -> VPU multiply + sublane (XLU) reduction.
        h3 = jnp.sum(w3 * h2, axis=0, keepdims=True) + b3            # (1, chunk)
        o_ref[:, pl.ds(off, chunk)] = jnp.maximum(h3, 0.0).astype(o_ref.dtype)
        return carry

    lax.fori_loop(0, n_chunks, body, 0)


def _round_up(a, m):
    return ((a + m - 1) // m) * m


def _layer1_dtype():
    """bf16 layer-1 on bf16-native-VPU chips (v6e/v7x); f32 elsewhere (v5e, ...)."""
    try:
        kind = jax.devices()[0].device_kind.lower()
    except Exception:
        return jnp.float32
    if "v6" in kind or "v7" in kind:
        return jnp.bfloat16
    return jnp.float32


def scoring_function_forward(x, params, *, tb=32768):
    """x: (B, 1) float32. params: w1(64,1) b1(64,1) w2(32,64) b2(32,1) w3(32,1) b3(1,1)."""
    l1_dtype = _layer1_dtype()
    # Inner chunk size keeps one chunk's h1/h2 plus the hoisted w1/b1 broadcasts
    # inside the 64-vreg register file (bf16 packs 2x per vreg -> bigger chunk).
    chunk = 256 if l1_dtype == jnp.bfloat16 else 128

    # Pre-cast params once in the wrapper: no per-grid-step casts in the kernel.
    w1 = params["w1"].astype(l1_dtype)
    b1 = params["b1"].astype(l1_dtype)
    w2 = params["w2"].astype(jnp.bfloat16)      # MXU operand dtype
    b2 = params["b2"].astype(jnp.float32)
    w3 = params["w3"].astype(jnp.float32)
    b3 = params["b3"].astype(jnp.float32)

    B = x.shape[0]

    # Batch tile (lanes per grid step): large enough to amortize the ~0.35us
    # per-grid-step overhead, a multiple of `chunk`, never (much) larger than
    # the batch, and small enough to keep >=4 grid steps on large batches so
    # both v7x TensorCores stay fed and DMA double-buffering has work.
    tile = min(tb, _round_up(B, chunk))
    if B > 4 * chunk:
        tile = min(tile, _round_up(-(-B // 4), chunk))
    B_pad = _round_up(B, tile)
    grid = (B_pad // tile,)
    n_chunks = tile // chunk

    # Batch-on-lanes layout: (B,1)->(1,B) is a free reshape.  The pad (a full
    # copy) is gated and only runs when B is not tile-aligned.  Padded lanes
    # compute relu(b1)-derived garbage that is sliced off below -- never add a
    # reduction over the batch axis inside the kernel.
    x_t = x.reshape(1, B)
    if B_pad != B:
        x_t = jnp.pad(x_t, ((0, 0), (0, B_pad - B)))

    const = lambda a: pl.BlockSpec(a.shape, lambda i: (0,) * a.ndim)

    kernel = functools.partial(_mlp_kernel, chunk=chunk, n_chunks=n_chunks)

    out_t = pl.pallas_call(
        kernel,
        out_shape=jax.ShapeDtypeStruct((1, B_pad), x.dtype),
        grid=grid,
        in_specs=[
            pl.BlockSpec((1, tile), lambda i: (0, i)),   # x tile
            const(w1), const(b1),
            const(w2), const(b2),
            const(w3), const(b3),
        ],
        out_specs=pl.BlockSpec((1, tile), lambda i: (0, i)),
        compiler_params=pltpu.CompilerParams(
            dimension_semantics=("parallel",),
            # ~4 double-buffered (8-sublane x tile) f32 slabs (~4 MiB at
            # tile=32768) + tiny weights; 32 MiB leaves headroom on v5e/v6e/v7x
            # and overrides v5e's 16 MiB default if tb is raised further.
            vmem_limit_bytes=32 * 1024 * 1024,
        ),
    )(x_t, w1, b1, w2, b2, w3, b3)

    return out_t.reshape(B_pad, 1)[:B, :]                 # back to (B, 1)


def init_params(key, input_dim=1, hidden_dims=(64, 32), output_dim=1):
    """PyTorch-style uniform(+/- 1/sqrt(fan_in)) init, stored in kernel layout."""
    dims = [input_dim, *hidden_dims, output_dim]
    params = {}
    for i, (din, dout) in enumerate(zip(dims[:-1], dims[1:]), start=1):
        key, kw, kb = jax.random.split(key, 3)
        bound = 1.0 / jnp.sqrt(jnp.float32(din))
        w = jax.random.uniform(kw, (dout, din), jnp.float32, -bound, bound)  # (out, in)
        b = jax.random.uniform(kb, (dout, 1), jnp.float32, -bound, bound)    # (out, 1)
        params[f"w{i}"], params[f"b{i}"] = w, b
    # Kernel layout: w1 (64,1), w2 (32,64) as-is; w3 stored transposed (in,out)=(32,1).
    params["w3"] = params["w3"].T                  # (32, 1)
    params["b3"] = params["b3"].T                  # (1, 1)
    return params


def _reference_forward(x, params):
    h1 = jnp.maximum(x @ params["w1"].T + params["b1"].T, 0.0)   # (B, 64)
    h2 = jnp.maximum(h1 @ params["w2"].T + params["b2"].T, 0.0)  # (B, 32)
    h3 = jnp.maximum(h2 @ params["w3"] + params["b3"], 0.0)      # (B, 1)
    return h3


if __name__ == "__main__":
    key = jax.random.PRNGKey(0)
    key, kx = jax.random.split(key)

    B = 8  # batch_size (small test shape; kernel tiles/pads internally)
    x = jax.random.uniform(kx, (B, 1), jnp.float32)  # softmax scores in [0, 1)

    params = init_params(key, input_dim=1, hidden_dims=(64, 32), output_dim=1)

    out = scoring_function_forward(x, params)
    out = jax.block_until_ready(out)

    ref = _reference_forward(x, params)
    assert out.shape == (B, 1), out.shape
    # Layer 2 (and on v6e/v7x layer 1) runs in bf16 with f32 accumulation, so the
    # tolerance is looser than an all-f32 comparison would need.
    assert jnp.allclose(out, ref, atol=3e-2, rtol=3e-2), "mismatch vs reference"

    print("KERNEL_OK")
</pallas_src>

<mosaic_0001>
module attributes {stable_mosaic.version = 11 : i64} {
  func.func @_mlp_kernel(%arg0: i32, %arg1: memref<1x128xf32, #tpu.memory_space<vmem>>, %arg2: memref<64x1xf32, #tpu.memory_space<vmem>>, %arg3: memref<64x1xf32, #tpu.memory_space<vmem>>, %arg4: memref<32x64xbf16, #tpu.memory_space<vmem>>, %arg5: memref<32x1xf32, #tpu.memory_space<vmem>>, %arg6: memref<32x1xf32, #tpu.memory_space<vmem>>, %arg7: memref<1x1xf32, #tpu.memory_space<vmem>>, %arg8: memref<1x128xf32, #tpu.memory_space<vmem>>) attributes {dimension_semantics = [#tpu.dimension_semantics<parallel>], iteration_bounds = array<i64: 1>, scalar_prefetch = 0 : i64, scratch_operands = 0 : i64, tpu.core_type = #tpu.core_type<tc>, window_params = [{transform_indices = @transform_0, window_bounds = array<i64: 1, 128>}, {pipeline_mode = #tpu.pipeline_mode<synchronous>, transform_indices = @transform_1, window_bounds = array<i64: 64, 1>}, {pipeline_mode = #tpu.pipeline_mode<synchronous>, transform_indices = @transform_2, window_bounds = array<i64: 64, 1>}, {pipeline_mode = #tpu.pipeline_mode<synchronous>, transform_indices = @transform_3, window_bounds = array<i64: 32, 64>}, {pipeline_mode = #tpu.pipeline_mode<synchronous>, transform_indices = @transform_4, window_bounds = array<i64: 32, 1>}, {pipeline_mode = #tpu.pipeline_mode<synchronous>, transform_indices = @transform_5, window_bounds = array<i64: 32, 1>}, {pipeline_mode = #tpu.pipeline_mode<synchronous>, transform_indices = @transform_6, window_bounds = array<i64: 1, 1>}, {transform_indices = @transform_7, window_bounds = array<i64: 1, 128>}]} {
    %c0 = arith.constant 0 : index
    %c0_0 = arith.constant 0 : index
    %0 = vector.load %arg2[%c0, %c0_0] : memref<64x1xf32, #tpu.memory_space<vmem>>, vector<64x1xf32>
    %1 = vector.shape_cast %0 : vector<64x1xf32> to vector<64x1xf32>
    %2 = vector.broadcast %1 : vector<64x1xf32> to vector<64x128xf32>
    %c0_1 = arith.constant 0 : index
    %c0_2 = arith.constant 0 : index
    %3 = vector.load %arg3[%c0_1, %c0_2] : memref<64x1xf32, #tpu.memory_space<vmem>>, vector<64x1xf32>
    %4 = vector.shape_cast %3 : vector<64x1xf32> to vector<64x1xf32>
    %5 = vector.broadcast %4 : vector<64x1xf32> to vector<64x128xf32>
    %c0_3 = arith.constant 0 : index
    %c0_4 = arith.constant 0 : index
    %6 = vector.load %arg4[%c0_3, %c0_4] : memref<32x64xbf16, #tpu.memory_space<vmem>>, vector<32x64xbf16>
    %c0_5 = arith.constant 0 : index
    %c0_6 = arith.constant 0 : index
    %7 = vector.load %arg5[%c0_5, %c0_6] : memref<32x1xf32, #tpu.memory_space<vmem>>, vector<32x1xf32>
    %c0_7 = arith.constant 0 : index
    %c0_8 = arith.constant 0 : index
    %8 = vector.load %arg6[%c0_7, %c0_8] : memref<32x1xf32, #tpu.memory_space<vmem>>, vector<32x1xf32>
    %c0_9 = arith.constant 0 : index
    %c0_10 = arith.constant 0 : index
    %9 = vector.load %arg7[%c0_9, %c0_10] : memref<1x1xf32, #tpu.memory_space<vmem>>, vector<1x1xf32>
    %c0_i32 = arith.constant 0 : i32
    %c128_i32 = arith.constant 128 : i32
    %10 = arith.muli %c0_i32, %c128_i32 : i32
    %11 = tpu.assume_multiple %10, 128 : i32
    %c0_11 = arith.constant 0 : index
    %12 = arith.index_cast %11 : i32 to index
    %13 = vector.load %arg1[%c0_11, %12] : memref<1x128xf32, #tpu.memory_space<vmem>>, vector<1x128xf32>
    %14 = vector.broadcast %13 : vector<1x128xf32> to vector<64x128xf32>
    %15 = arith.mulf %2, %14 : vector<64x128xf32>
    %16 = arith.addf %15, %5 : vector<64x128xf32>
    %cst = arith.constant 0.000000e+00 : f32
    %17 = vector.broadcast %cst : f32 to vector<64x128xf32>
    %18 = arith.maximumf %16, %17 : vector<64x128xf32>
    %19 = arith.truncf %18 : vector<64x128xf32> to vector<64x128xbf16>
    %cst_12 = arith.constant dense<0.000000e+00> : vector<32x128xf32>
    %20 = tpu.matmul %6, %19, %cst_12 {dimension_numbers = #tpu.dot_dimension_numbers<[1], [0], [0], [1], [0, 0, 1, 1], [], []>} : vector<32x64xbf16>, vector<64x128xbf16>, vector<32x128xf32> -> vector<32x128xf32>
    %21 = vector.broadcast %7 : vector<32x1xf32> to vector<32x128xf32>
    %22 = arith.addf %20, %21 : vector<32x128xf32>
    %cst_13 = arith.constant 0.000000e+00 : f32
    %23 = vector.broadcast %cst_13 : f32 to vector<32x128xf32>
    %24 = arith.maximumf %22, %23 : vector<32x128xf32>
    %25 = vector.broadcast %8 : vector<32x1xf32> to vector<32x128xf32>
    %26 = arith.mulf %25, %24 : vector<32x128xf32>
    %cst_14 = arith.constant dense<0.000000e+00> : vector<128xf32>
    %27 = vector.multi_reduction <add>, %26, %cst_14 [0] : vector<32x128xf32> to vector<128xf32>
    %28 = vector.shape_cast %27 : vector<128xf32> to vector<1x128xf32>
    %29 = vector.broadcast %9 : vector<1x1xf32> to vector<1x128xf32>
    %30 = arith.addf %28, %29 : vector<1x128xf32>
    %cst_15 = arith.constant 0.000000e+00 : f32
    %31 = vector.broadcast %cst_15 : f32 to vector<1x128xf32>
    %32 = arith.maximumf %30, %31 : vector<1x128xf32>
    %c0_16 = arith.constant 0 : index
    %33 = arith.index_cast %11 : i32 to index
    %34 = vector.load %arg8[%c0_16, %33] : memref<1x128xf32, #tpu.memory_space<vmem>>, vector<1x128xf32>
    tpu.vector_store %arg8[%c0_16, %33], %32 {strides = array<i32>} : memref<1x128xf32, #tpu.memory_space<vmem>>, vector<1x128xf32>,
    %c1_i32 = arith.constant 1 : i32
    return
  }
  func.func @transform_0(%arg0: i32) -> (i32, i32) {
    %c0_i32 = arith.constant 0 : i32
    %c0_i32_0 = arith.constant 0 : i32
    return %c0_i32, %arg0 : i32, i32
  }
  func.func @transform_1(%arg0: i32) -> (i32, i32) {
    %c0_i32 = arith.constant 0 : i32
    %c0_i32_0 = arith.constant 0 : i32
    %c0_i32_1 = arith.constant 0 : i32
    return %c0_i32, %c0_i32_0 : i32, i32
  }
  func.func @transform_2(%arg0: i32) -> (i32, i32) {
    %c0_i32 = arith.constant 0 : i32
    %c0_i32_0 = arith.constant 0 : i32
    %c0_i32_1 = arith.constant 0 : i32
    return %c0_i32, %c0_i32_0 : i32, i32
  }
  func.func @transform_3(%arg0: i32) -> (i32, i32) {
    %c0_i32 = arith.constant 0 : i32
    %c0_i32_0 = arith.constant 0 : i32
    %c0_i32_1 = arith.constant 0 : i32
    return %c0_i32, %c0_i32_0 : i32, i32
  }
  func.func @transform_4(%arg0: i32) -> (i32, i32) {
    %c0_i32 = arith.constant 0 : i32
    %c0_i32_0 = arith.constant 0 : i32
    %c0_i32_1 = arith.constant 0 : i32
    return %c0_i32, %c0_i32_0 : i32, i32
  }
  func.func @transform_5(%arg0: i32) -> (i32, i32) {
    %c0_i32 = arith.constant 0 : i32
    %c0_i32_0 = arith.constant 0 : i32
    %c0_i32_1 = arith.constant 0 : i32
    return %c0_i32, %c0_i32_0 : i32, i32
  }
  func.func @transform_6(%arg0: i32) -> (i32, i32) {
    %c0_i32 = arith.constant 0 : i32
    %c0_i32_0 = arith.constant 0 : i32
    %c0_i32_1 = arith.constant 0 : i32
    return %c0_i32, %c0_i32_0 : i32, i32
  }
  func.func @transform_7(%arg0: i32) -> (i32, i32) {
    %c0_i32 = arith.constant 0 : i32
    %c0_i32_0 = arith.constant 0 : i32
    return %c0_i32, %arg0 : i32, i32
  }
}

</mosaic_0001>

<bundles_post_ra>
// kernel: tpu_custom_call.1
= control target key start
LH: loop header
LB: loop body
LE: loop exit
PB: predicated region body
PF: predicated region fallthrough
CT: control target
= control target key end

     0   :  { %s466_s0 = inlined_call_operand.vmem [shape: f32[1,128], index: 0, kind: input, shape index: {}]   ;;  %s467_s1 = inlined_call_operand.vmem [shape: f32[64,1], index: 1, kind: input, shape index: {}]   ;;  %s468_s2 = inlined_call_operand.vmem [shape: f32[64,1], index: 2, kind: input, shape index: {}]   ;;  %s469_s3 = inlined_call_operand.vmem [shape: bf16[32,64], index: 3, kind: input, shape index: {}]   ;;  %s470_s4 = inlined_call_operand.vmem [shape: f32[32,1], index: 4, kind: input, shape index: {}]   ;;  %s471_s5 = inlined_call_operand.vmem [shape: f32[32,1], index: 5, kind: input, shape index: {}]   ;;  %s472_s6 = inlined_call_operand.<no memory space> [shape: f32[1,1], index: 6, kind: input, shape index: {}]   ;;  %s473_s7 = inlined_call_operand.hbm [shape: f32[1,128], index: 7, kind: output, shape index: {}]  }
   0x1   :  { %v12_v0 = vstv %s472_s6 }
   0x2   :  { %13 = vst [vmem:[#allocation2] sm:$0x1] %v12_v0 }
   0x3   :  { %v84_v1 = vld [vmem:[%s468_s2 + $0x30] sm:$0xff]  ;;  %v34_v3 = vld [vmem:[%s467_s1 + $0x20] sm:$0xff]  ;;  %v337_v4 = vmov 0  }
   0x4   :  { %v36_v2 = vld [vmem:[%s467_s1 + $0x30] sm:$0xff]  ;;  %309 = vset.pattern.permute.xlu2 %v337_v4  ;;  %308 = vset.pattern.permute.xlu1 %v337_v4 }
   0x5   :  { %307 = vset.pattern.permute.xlu0 %v337_v4  ;;  %118 = vperm.xlu1 %308, %v84_v1  }
   0x6   :  { %70 = vperm.xlu0 %307, %v36_v2   ;;  %60 = vperm.xlu2 %309, %v34_v3  }
   0x7   :  { %14 = vsyncpa [#allocation4], 0  ;;  %v85_v5 = vld [vmem:[%s468_s2 + $0x38] sm:$0xff]  ;;  %v35_v7 = vld [vmem:[%s467_s1 + $0x28] sm:$0xff]  ;;  %vm201_vm0 = vcmask 523264   ;;  %s280_s30 = sshll.u32 %s473_s7, 4  ;;  %s281_s30 = int_to_ptr.hbm [resolvable:$true] %s280_s30 }
   0x8   :  { %v37_v6 = vld [vmem:[%s467_s1 + $0x38] sm:$0xff]  ;;  %v83_v8 = vld [vmem:[%s468_s2 + $0x28] sm:$0xff]  ;;  %v82_v9 = vld [vmem:[%s468_s2 + $0x20] sm:$0xff] }
   0x9   :  { %v32_v10 = vld [vmem:[%s467_s1 + $0x10] sm:$0xff]  ;;  %v33_v12 = vld [vmem:[%s467_s1 + $0x18] sm:$0xff]  ;;  %v31_v14 = vld [vmem:[%s467_s1 + $0x8] sm:$0xff] }
   0xa   :  { %v80_v11 = vld [vmem:[%s468_s2 + $0x10] sm:$0xff]  ;;  %v81_v13 = vld [vmem:[%s468_s2 + $0x18] sm:$0xff]  ;;  %v78_v15 = vld [vmem:[%s468_s2] sm:$0xff] }
   0xb   :  { %v30_v16 = vld [vmem:[%s467_s1] sm:$0xff]  ;;  %v131_v18 = vld [vmem:[%s470_s4 + $0x8] sm:$0xff]  ;;  %v133_v20 = vld [vmem:[%s470_s4 + $0x18] sm:$0xff] }
   0xc   :  { %v130_v17 = vld [vmem:[%s470_s4] sm:$0xff]  ;;  %v79_v19 = vld [vmem:[%s468_s2 + $0x8] sm:$0xff]  ;;  %v132_v22 = vld [vmem:[%s470_s4 + $0x10] sm:$0xff] }
   0xd   :  { %123 = vperm.xlu1 %308, %v85_v5   ;;  %v134_v21 = vld [vmem:[%s471_s5] sm:$0xff]  ;;  %v136_v23 = vld [vmem:[%s471_s5 + $0x10] sm:$0xff]  ;;  %v137_v24 = vld [vmem:[%s471_s5 + $0x18] sm:$0xff] }
   0xe   :  { %75 = vperm.xlu0 %307, %v37_v6   ;;  %65 = vperm.xlu2 %309, %v35_v7   ;;  %v135_v25 = vld [vmem:[%s471_s5 + $0x8] sm:$0xff]  ;;  %v138_v26 = vld [vmem:[#allocation2] sm:$0x1] }
   0xf   :  { %v310_v30 = vld [vmem:[%s466_s0] ss:$0 sm:$0xff] }
  0x15   :  { %113 = vperm.xlu1 %308, %v83_v8   ;;  %v299_v8 = vld [vmem:[%s469_s3] sm:$0xff] }
  0x16   :  { %108 = vperm.xlu0 %307, %v82_v9   ;;  %50 = vperm.xlu2 %309, %v32_v10   ;;  %v300_v9 = vld [vmem:[%s469_s3 + $0x8] sm:$0xff]  ;;  %s338_s3 = smov [#allocation3]  }
  0x17   :  { %s278_s27 = sshll.u32 %s338_s3, 4  ;;  %s279_s27 = int_to_ptr.vmem [resolvable:$true] %s278_s27 }
  0x1d   :  { %98 = vperm.xlu1 %308, %v80_v11  }
  0x1e   :  { %55 = vperm.xlu0 %307, %v33_v12   ;;  %103 = vperm.xlu2 %309, %v81_v13  }
  0x25   :  { %45 = vperm.xlu1 %308, %v31_v14  }
  0x26   :  { %88 = vperm.xlu2 %309, %v78_v15   ;;  %40 = vperm.xlu0 %307, %v30_v16  }
  0x2d   :  { %173 = vperm.xlu1 %308, %v130_v17  }
  0x2e   :  { %178 = vperm.xlu2 %309, %v131_v18   ;;  %93 = vperm.xlu0 %307, %v79_v19  }
  0x35   :  { %188 = vperm.xlu1 %308, %v133_v20  }
  0x36   :  { %233 = vperm.xlu2 %309, %v134_v21   ;;  %183 = vperm.xlu0 %307, %v132_v22  }
  0x3d   :  { %243 = vperm.xlu1 %308, %v136_v23  }
  0x3e   :  { %248 = vperm.xlu2 %309, %v137_v24   ;;  %238 = vperm.xlu0 %307, %v135_v25  }
  0x46   :  { %266 = vperm.xlu0 %307, %v138_v26  }
  0x60   :  { %v61_v27 = vpop.permute.xlu2 %60 }
  0x61   :  { %v147_v41 = vmul.f32 %v310_v30, %v61_v27 }
  0x68   :  { %v66_v32 = vpop.permute.xlu2 %65 }
  0x69   :  { %v148_v40 = vmul.f32 %v310_v30, %v66_v32 }
  0x70   :  { %v51_v44 = vpop.permute.xlu2 %50 }
  0x71   :  { %v145_v51 = vmul.f32 %v310_v30, %v51_v44 }
  0x77   :  { %v119_v28 = vpop.permute.xlu1 %118 }
  0x78   :  { %v71_v29 = vpop.permute.xlu0 %70  ;;  %v104_v56 = vpop.permute.xlu2 %103 }
  0x79   :  { %v149_v31 = vmul.f32 %v310_v30, %v71_v29 }
  0x7b   :  { %v157_v35 = vadd.f32 %v149_v31, %v119_v28 }
  0x7d   :  { %v165_v38 = vmax.f32 %v157_v35, 0.0 }
  0x7f   :  { %v124_v33 = vpop.permute.xlu1 %123 }
  0x80   :  { %v76_v34 = vpop.permute.xlu0 %75  ;;  %v89_v0 = vpop.permute.xlu2 %88 }
  0x81   :  { %v150_v36 = vmul.f32 %v310_v30, %v76_v34 }
  0x83   :  { %v158_v37 = vadd.f32 %v150_v36, %v124_v33 }
  0x85   :  { %v166_v39 = vmax.f32 %v158_v37, 0.0 }
  0x87   :  { %v114_v42 = vpop.permute.xlu1 %113  ;;  %v170_v43 = vpack.c.bf16 %v166_v39, %v165_v38 }
  0x88   :  { %v156_v45 = vadd.f32 %v148_v40, %v114_v42  ;;  %v109_v46 = vpop.permute.xlu0 %108  ;;  %v179_v11 = vpop.permute.xlu2 %178 }
  0x89   :  { %v155_v47 = vadd.f32 %v147_v41, %v109_v46  ;;  %212 = vmatpush.bf16.msra.mxu0 %v170_v43  ;;  %301 = vmatpush.bf16.msra.mxu1 %v170_v43 }
  0x8a   :  { %v164_v48 = vmax.f32 %v156_v45, 0.0 }
  0x8b   :  { %v163_v49 = vmax.f32 %v155_v47, 0.0 }
  0x8d   :  { %v169_v50 = vpack.c.bf16 %v164_v48, %v163_v49 }
  0x8f   :  { %213 = vmatpush.bf16.msra.mxu0 %v169_v50  ;;  %302 = vmatpush.bf16.msra.mxu1 %v169_v50  ;;  %v99_v52 = vpop.permute.xlu1 %98 }
  0x90   :  { %v56_v53 = vpop.permute.xlu0 %55  ;;  %v153_v54 = vadd.f32 %v145_v51, %v99_v52  ;;  %v234_v17 = vpop.permute.xlu2 %233 }
  0x91   :  { %v146_v55 = vmul.f32 %v310_v30, %v56_v53 }
  0x92   :  { %v161_v58 = vmax.f32 %v153_v54, 0.0 }
  0x93   :  { %v154_v57 = vadd.f32 %v146_v55, %v104_v56 }
  0x95   :  { %v162_v59 = vmax.f32 %v154_v57, 0.0 }
  0x97   :  { %v168_v60 = vpack.c.bf16 %v162_v59, %v161_v58  ;;  %v46_v63 = vpop.permute.xlu1 %45 }
  0x98   :  { %v41_v61 = vpop.permute.xlu0 %40  ;;  %v144_v1 = vmul.f32 %v310_v30, %v46_v63  ;;  %v249_v33 = vpop.permute.xlu2 %248 }
  0x99   :  { %214 = vmatpush.bf16.msra.mxu0 %v168_v60  ;;  %303 = vmatpush.bf16.msra.mxu1 %v168_v60  ;;  %v143_v62 = vmul.f32 %v310_v30, %v41_v61 }
  0x9b   :  { %v151_v2 = vadd.f32 %v143_v62, %v89_v0 }
  0x9d   :  { %v159_v5 = vmax.f32 %v151_v2, 0.0 }
  0x9f   :  { %v174_v10 = vpop.permute.xlu1 %173 }
  0xa0   :  { %v94_v3 = vpop.permute.xlu0 %93 }
  0xa1   :  { %v152_v4 = vadd.f32 %v144_v1, %v94_v3 }
  0xa3   :  { %v160_v6 = vmax.f32 %v152_v4, 0.0 }
  0xa5   :  { %v167_v7 = vpack.c.bf16 %v160_v6, %v159_v5 }
  0xa7   :  { %215 = vmatpush.bf16.msra.mxu0 %v167_v7  ;;  %304 = vmatpush.bf16.msra.mxu1 %v167_v7  ;;  %v189_v15 = vpop.permute.xlu1 %188 }
  0xa8   :  { %v184_v14 = vpop.permute.xlu0 %183 }
  0xaa   :  { %297 = vmatmul.msk.bf16.vlgmr.msra.gmra.mxu0 %vm201_vm0, %v299_v8  ;;  %298 = vmatmul.msk.bf16.vlgmr.msra.gmra.mxu1 %vm201_vm0, %v300_v9 }
  0xaf   :  { %v244_v30 = vpop.permute.xlu1 %243 }
  0xb0   :  { %v239_v26 = vpop.permute.xlu0 %238 }
  0xb8   :  { %v267_v41 = vpop.permute.xlu0 %266 }
  0xb9   :  { %v269_v43 = vperm.slane %v267_v41, 0 }
 0x127   :  { %v217_v12 = vpop.f32.mrf.mxu0  ;;  %v222_v13 = vpop.f32.mrf.mxu1 }
 0x128   :  { %v218_v16 = vadd.f32 %v217_v12, %v174_v10  ;;  %v223_v18 = vadd.f32 %v222_v13, %v184_v14 }
 0x12a   :  { %v227_v21 = vmax.f32 %v218_v16, 0.0  ;;  %v229_v24 = vmax.f32 %v223_v18, 0.0 }
 0x12c   :  { %v251_v27 = vmul.f32 %v234_v17, %v227_v21  ;;  %v253_v31 = vmul.f32 %v244_v30, %v229_v24 }
 0x12f   :  { %v219_v19 = vpop.f32.mrf.mxu0  ;;  %v224_v20 = vpop.f32.mrf.mxu1 }
 0x130   :  { %v220_v22 = vadd.f32 %v219_v19, %v179_v11  ;;  %v225_v23 = vadd.f32 %v224_v20, %v189_v15 }
 0x132   :  { %v228_v25 = vmax.f32 %v220_v22, 0.0  ;;  %v230_v29 = vmax.f32 %v225_v23, 0.0 }
 0x134   :  { %v252_v28 = vmul.f32 %v239_v26, %v228_v25  ;;  %v254_v34 = vmul.f32 %v249_v33, %v230_v29 }
 0x136   :  { %v255_v32 = vadd.f32 %v252_v28, %v251_v27 }
 0x138   :  { %v256_v35 = vadd.f32 %v255_v32, %v253_v31 }
 0x13a   :  { %v257_v36 = vadd.f32 %v256_v35, %v254_v34 }
 0x13c   :  { %v258_v37 = vrot.slane %v257_v36, 4 }
 0x13e   :  { %v259_v38 = vadd.f32 %v258_v37, %v257_v36 }
 0x140   :  { %v260_v39 = vrot.slane %v259_v38, 2 }
 0x142   :  { %v261_v40 = vadd.f32 %v260_v39, %v259_v38 }
 0x144   :  { %v262_v42 = vrot.slane %v261_v40, 1 }
 0x146   :  { %v263_v44 = vadd.f32 %v262_v42, %v261_v40 }
 0x148   :  { %v270_v45 = vadd.f32 %v269_v43, %v263_v44 }
 0x14a   :  { %v271_v46 = vmax.f32 %v270_v45, 0.0 }
 0x14c   :  { %272 = vst [vmem:[#allocation3] sm:$0x1] %v271_v46 }
 0x14d   :  { %283 = dma.vmem_to_hbm [thread:$0]  %s279_s27, 16, %s281_s30, [#allocation4]  }
 0x14e   :  { %335 = dma.done.wait [#allocation4], 16  }
 0x14f   :  { %336 = vsyncadd [#allocation4], 4294967280 }
 0x150   :  { %288 = vsyncpa [#allocation4], 1 }

</bundles_post_ra>
